<compile_context>
chip_gen: v7x
topology: tpu7x:2x2x1
jax: 0.10.0
libtpu: 0.0.40
codegen_flags: <defaults>
</compile_context>

<pallas_src>
import jax
import jax.numpy as jnp
from jax.experimental import pallas as pl
from jax.experimental.pallas import tpu as pltpu

NUM_CLASSES = 7
VECTOR_SIZE = 32            # stands in for model.wv.vector_size
HIDDEN = VECTOR_SIZE // 2   # 16
C_PAD = 8                   # classes padded to one sublane group


def nn_classifier_kernel(wt_ref, b_ref, x_ref, out_ref):
    # wt : (C_PAD, D)  bf16   folded weight, classes on sublanes (row 7 = zero pad)
    # b  : (C_PAD, 1)  f32    folded bias (row 7 = -1e30 -> exp() == 0)
    # x  : (TB, D)     f32    natural batch-major input tile (no wrapper relayout)
    # out: (TB, C)     f32/bf16 softmax probabilities, batch-major

    x_bf = x_ref[...].astype(jnp.bfloat16)            # VPU cast, hidden under the DMA

    # logits[c, b] = sum_d W[c, d] * x[b, d]  (contract last dims of both, like QK^T)
    logits = jax.lax.dot_general(
        wt_ref[...], x_bf,
        dimension_numbers=(((1,), (1,)), ((), ())),
        preferred_element_type=jnp.float32) + b_ref[...]          # (C_PAD, TB), f32

    # Numerically-stable softmax over the 8 class sublanes; batch stays lane-dense.
    m = jnp.max(logits, axis=0, keepdims=True)                    # (1, TB)
    e = jnp.exp(logits - m)                                       # (C_PAD, TB)
    denom = jnp.sum(e, axis=0, keepdims=True)                     # (1, TB)
    probs_cb = e * pl.reciprocal(denom, approx=True)              # (C_PAD, TB)

    # Emit batch-major layout here (tiny XLU transpose) so the wrapper needs no
    # standalone un-transpose pass over the output.
    probs_bc = probs_cb.T                                         # (TB, C_PAD)
    out_ref[...] = probs_bc[:, :NUM_CLASSES].astype(out_ref.dtype)


def fold_params(w1, b1, w2, b2):
    """One-time fold of the two bias-only linears (hoist out of the per-call path)."""
    w = jnp.dot(w1, w2)                                           # (D, C) f32
    b = jnp.dot(b1.reshape(1, -1), w2) + b2.reshape(1, -1)        # (1, C) f32
    D, C = w.shape
    # Pad classes to 8 sublanes: zero weights, -1e30 bias -> padded class prob == 0.
    wt = jnp.zeros((C_PAD, D), jnp.float32).at[:C, :].set(w.T).astype(jnp.bfloat16)
    bt = jnp.full((C_PAD, 1), -1e30, jnp.float32).at[:C, 0].set(b[0])
    return wt, bt


def nn_classifier_apply(x, wt, bt, *, block_b=None, out_dtype=jnp.float32):
    """x: (B, D) f32 natural layout; wt/bt: folded params -> (B, NUM_CLASSES) probs."""
    B, D = x.shape

    # Sub-lane-tile batches: pad up to one 128-row tile (negligible). For B >= 128,
    # x passes through untouched and the partial last block is masked by Pallas.
    if B < 128:
        x_in = jnp.pad(x, ((0, 128 - B), (0, 0)))
    else:
        x_in = x
    Bk = x_in.shape[0]

    if block_b is None:
        # >= 2 grid steps when the batch allows it (both TensorCores on v7x);
        # cap at 32768 rows (x tile 4 MiB f32, comfortably under scoped VMEM).
        block_b = min(32768, max(128, pl.cdiv(Bk, 2 * 128) * 128))

    grid = (pl.cdiv(Bk, block_b),)

    out = pl.pallas_call(
        nn_classifier_kernel,
        out_shape=jax.ShapeDtypeStruct((Bk, NUM_CLASSES), out_dtype),
        grid_spec=pltpu.PrefetchScalarGridSpec(
            num_scalar_prefetch=0,
            grid=grid,
            in_specs=[
                pl.BlockSpec((C_PAD, D), lambda i: (0, 0)),        # folded weight, resident
                pl.BlockSpec((C_PAD, 1), lambda i: (0, 0)),        # folded bias, resident
                pl.BlockSpec((block_b, D), lambda i: (i, 0)),      # natural-layout x tile
            ],
            out_specs=pl.BlockSpec((block_b, NUM_CLASSES), lambda i: (i, 0)),
        ),
        compiler_params=pltpu.CompilerParams(
            dimension_semantics=("parallel",),  # batch grid shards across TCs (v7x)
        ),
    )(wt, bt, x_in)

    return out if Bk == B else out[:B]


def nn_classifier_forward(x, w1, b1, w2, b2, **kwargs):
    """One-shot convenience. For repeated inference, call fold_params once and reuse."""
    wt, bt = fold_params(w1, b1, w2, b2)
    return nn_classifier_apply(x, wt, bt, **kwargs)


if __name__ == "__main__":
    key = jax.random.PRNGKey(0)
    k_x, k_w1, k_b1, k_w2, k_b2 = jax.random.split(key, 5)

    B = 8  # small demo batch of embedded documents

    # Deterministic synthetic parameters (nn.Linear weights, stored pre-transposed
    # as (in_features, out_features)).
    x = jax.random.normal(k_x, (B, VECTOR_SIZE), dtype=jnp.float32)
    w1 = jax.random.normal(k_w1, (VECTOR_SIZE, HIDDEN), dtype=jnp.float32) * 0.1
    b1 = jax.random.normal(k_b1, (1, HIDDEN), dtype=jnp.float32) * 0.1
    w2 = jax.random.normal(k_w2, (HIDDEN, NUM_CLASSES), dtype=jnp.float32) * 0.1
    b2 = jax.random.normal(k_b2, (1, NUM_CLASSES), dtype=jnp.float32) * 0.1

    # Hoisted fold: compute folded params once, close over them, jit the apply.
    wt, bt = fold_params(w1, b1, w2, b2)
    infer = jax.jit(lambda xx: nn_classifier_apply(xx, wt, bt))

    probs = jax.block_until_ready(infer(x))

    # Sanity-check against plain-JAX f32 reference of the original (unfolded) forward.
    ref = jax.nn.softmax(jnp.dot(jnp.dot(x, w1) + b1, w2) + b2, axis=-1)
    assert probs.shape == (B, NUM_CLASSES)
    assert jnp.allclose(probs, ref, atol=2e-2), "mismatch vs reference"
    assert jnp.allclose(jnp.sum(probs, axis=-1), 1.0, atol=1e-2)

    print("KERNEL_OK")
</pallas_src>

<mosaic_0001>
module attributes {stable_mosaic.version = 11 : i64} {
  func.func @nn_classifier_kernel(%arg0: i32, %arg1: memref<8x32xbf16, #tpu.memory_space<vmem>>, %arg2: memref<8x1xf32, #tpu.memory_space<vmem>>, %arg3: memref<128x32xf32, #tpu.memory_space<vmem>>, %arg4: memref<128x7xf32, #tpu.memory_space<vmem>>) attributes {dimension_semantics = [#tpu.dimension_semantics<parallel>], iteration_bounds = array<i64: 1>, scalar_prefetch = 0 : i64, scratch_operands = 0 : i64, tpu.core_type = #tpu.core_type<tc>, window_params = [{pipeline_mode = #tpu.pipeline_mode<synchronous>, transform_indices = @transform_0, window_bounds = array<i64: 8, 32>}, {pipeline_mode = #tpu.pipeline_mode<synchronous>, transform_indices = @transform_1, window_bounds = array<i64: 8, 1>}, {transform_indices = @transform_2, window_bounds = array<i64: 128, 32>}, {transform_indices = @transform_3, window_bounds = array<i64: 128, 7>}]} {
    %c0 = arith.constant 0 : index
    %c0_0 = arith.constant 0 : index
    %0 = vector.load %arg3[%c0, %c0_0] : memref<128x32xf32, #tpu.memory_space<vmem>>, vector<128x32xf32>
    %1 = arith.truncf %0 : vector<128x32xf32> to vector<128x32xbf16>
    %c0_1 = arith.constant 0 : index
    %c0_2 = arith.constant 0 : index
    %2 = vector.load %arg1[%c0_1, %c0_2] : memref<8x32xbf16, #tpu.memory_space<vmem>>, vector<8x32xbf16>
    %cst = arith.constant dense<0.000000e+00> : vector<8x128xf32>
    %3 = tpu.matmul %2, %1, %cst {dimension_numbers = #tpu.dot_dimension_numbers<[1], [1], [0], [0], [0, 0, 1, 0], [], []>} : vector<8x32xbf16>, vector<128x32xbf16>, vector<8x128xf32> -> vector<8x128xf32>
    %c0_3 = arith.constant 0 : index
    %c0_4 = arith.constant 0 : index
    %4 = vector.load %arg2[%c0_3, %c0_4] : memref<8x1xf32, #tpu.memory_space<vmem>>, vector<8x1xf32>
    %5 = vector.broadcast %4 : vector<8x1xf32> to vector<8x128xf32>
    %6 = arith.addf %3, %5 : vector<8x128xf32>
    %cst_5 = arith.constant dense<0xFF800000> : vector<128xf32>
    %7 = vector.multi_reduction <maximumf>, %6, %cst_5 [0] : vector<8x128xf32> to vector<128xf32>
    %8 = vector.shape_cast %7 : vector<128xf32> to vector<1x128xf32>
    %9 = vector.broadcast %8 : vector<1x128xf32> to vector<8x128xf32>
    %10 = arith.subf %6, %9 : vector<8x128xf32>
    %11 = math.exp %10 : vector<8x128xf32>
    %cst_6 = arith.constant dense<0.000000e+00> : vector<128xf32>
    %12 = vector.multi_reduction <add>, %11, %cst_6 [0] : vector<8x128xf32> to vector<128xf32>
    %13 = vector.shape_cast %12 : vector<128xf32> to vector<1x128xf32>
    %14 = tpu.reciprocal %13 {approx = true} : vector<1x128xf32> -> vector<1x128xf32>
    %15 = vector.broadcast %14 : vector<1x128xf32> to vector<8x128xf32>
    %16 = arith.mulf %11, %15 : vector<8x128xf32>
    %17 = tpu.transpose %16, [1, 0] : vector<8x128xf32> -> vector<128x8xf32>
    %18 = vector.extract_strided_slice %17 {offsets = [0, 0], sizes = [128, 7], strides = [1, 1]} : vector<128x8xf32> to vector<128x7xf32>
    %c0_7 = arith.constant 0 : index
    %c0_8 = arith.constant 0 : index
    %19 = vector.load %arg4[%c0_7, %c0_8] : memref<128x7xf32, #tpu.memory_space<vmem>>, vector<128x7xf32>
    tpu.vector_store %arg4[%c0_7, %c0_8], %18 {strides = array<i32>} : memref<128x7xf32, #tpu.memory_space<vmem>>, vector<128x7xf32>,
    return
  }
  func.func @transform_0(%arg0: i32) -> (i32, i32) {
    %c0_i32 = arith.constant 0 : i32
    %c0_i32_0 = arith.constant 0 : i32
    %c0_i32_1 = arith.constant 0 : i32
    return %c0_i32, %c0_i32_0 : i32, i32
  }
  func.func @transform_1(%arg0: i32) -> (i32, i32) {
    %c0_i32 = arith.constant 0 : i32
    %c0_i32_0 = arith.constant 0 : i32
    %c0_i32_1 = arith.constant 0 : i32
    return %c0_i32, %c0_i32_0 : i32, i32
  }
  func.func @transform_2(%arg0: i32) -> (i32, i32) {
    %c0_i32 = arith.constant 0 : i32
    %c0_i32_0 = arith.constant 0 : i32
    return %arg0, %c0_i32 : i32, i32
  }
  func.func @transform_3(%arg0: i32) -> (i32, i32) {
    %c0_i32 = arith.constant 0 : i32
    %c0_i32_0 = arith.constant 0 : i32
    return %arg0, %c0_i32 : i32, i32
  }
}

</mosaic_0001>

<bundles_post_ra>
// kernel: _lambda_.1
= control target key start
LH: loop header
LB: loop body
LE: loop exit
PB: predicated region body
PF: predicated region fallthrough
CT: control target
= control target key end

     0   :  { %v222_v0 = vmov 0.0   ;;  %vm46_vm0 = vcmask 261120   ;;  %vm223_vm1 = vmmov 0   ;;  %v224_v4 = vmov 0   ;;  %s372_s2 = inlined_call_operand.vmem [shape: f32[128,32], index: 2, kind: input, shape index: {}]   ;;  %s373_s1 = inlined_call_operand.vmem [shape: f32[8,1], index: 1, kind: input, shape index: {}]   ;;  %s374_s0 = inlined_call_operand.vmem [shape: bf16[8,32], index: 0, kind: input, shape index: {}]   ;;  %s375_s3 = inlined_call_operand.vmem [shape: f32[128,7], index: 3, kind: output, shape index: {}]  }
   0x1   :  { %194 = vmatprep.subr.bf16.mxu0 %v222_v0  ;;  %v15_v1 = vld [vmem:[%s372_s2] sm:$0xff]  ;;  %v16_v2 = vld [vmem:[%s372_s2 + $0x8] sm:$0xff]  ;;  %210 = vmatprep.mubr.msk.bf16.mxu0 %vm223_vm1, %v222_v0  ;;  %v17_v5 = vld [vmem:[%s372_s2 + $0x10] sm:$0xff]  ;;  %vm163_vm2 = vcmask 56320  }
   0x2   :  { %v31_v3 = vpack.c.bf16 %v16_v2, %v15_v1  ;;  %217 = vset.pattern.permute.xlu0 %v224_v4  ;;  %v18_v6 = vld [vmem:[%s372_s2 + $0x18] sm:$0xff]  ;;  %v40_v9 = vld [vmem:[%s373_s1] sm:$0xff]  ;;  %v20_v12 = vld [vmem:[%s372_s2 + $0x28] sm:$0xff] }
   0x3   :  { %v32_v8 = vpack.c.bf16 %v18_v6, %v17_v5  ;;  %43 = vperm.xlu0 %217, %v40_v9   ;;  %v19_v11 = vld [vmem:[%s372_s2 + $0x20] sm:$0xff]  ;;  %v21_v15 = vld [vmem:[%s372_s2 + $0x30] sm:$0xff]  ;;  %v22_v16 = vld [vmem:[%s372_s2 + $0x38] sm:$0xff] }
   0x4   :  { %v51_v7 = vsel %vm46_vm0, %v31_v3, 0  ;;  %v33_v13 = vpack.c.bf16 %v20_v12, %v19_v11  ;;  %v34_v17 = vpack.c.bf16 %v22_v16, %v21_v15  ;;  %v23_v19 = vld [vmem:[%s372_s2 + $0x40] sm:$0xff]  ;;  %v24_v20 = vld [vmem:[%s372_s2 + $0x48] sm:$0xff]  ;;  %v25_v23 = vld [vmem:[%s372_s2 + $0x50] sm:$0xff] }
   0x5   :  { %195 = vmatpush3.bf16.xpose.msra.mxu0 %v51_v7  ;;  %v54_v10 = vsel %vm46_vm0, %v32_v8, 0  ;;  %v35_v21 = vpack.c.bf16 %v24_v20, %v23_v19  ;;  %v26_v24 = vld [vmem:[%s372_s2 + $0x58] sm:$0xff]  ;;  %v27_v27 = vld [vmem:[%s372_s2 + $0x60] sm:$0xff]  ;;  %v28_v28 = vld [vmem:[%s372_s2 + $0x68] sm:$0xff] }
   0x6   :  { %196 = vmatprep.subr.bf16.mxu0 %v222_v0  ;;  %v57_v14 = vsel %vm46_vm0, %v33_v13, 0  ;;  %v60_v18 = vsel %vm46_vm0, %v34_v17, 0  ;;  %v36_v25 = vpack.c.bf16 %v26_v24, %v25_v23  ;;  %v37_v29 = vpack.c.bf16 %v28_v28, %v27_v27  ;;  %v29_v31 = vld [vmem:[%s372_s2 + $0x70] sm:$0xff]  ;;  %v30_v32 = vld [vmem:[%s372_s2 + $0x78] sm:$0xff]  ;;  %v39_v35 = vld [vmem:[%s374_s0] sm:$0xf] }
   0x7   :  { %v63_v22 = vsel %vm46_vm0, %v35_v21, 0  ;;  %v38_v33 = vpack.c.bf16 %v30_v32, %v29_v31 }
   0x8   :  { %v66_v26 = vsel %vm46_vm0, %v36_v25, 0  ;;  %v69_v30 = vsel %vm46_vm0, %v37_v29, 0 }
   0x9   :  { %v72_v34 = vsel %vm46_vm0, %v38_v33, 0 }
   0xd   :  { %197 = vmatpush3.bf16.xpose.msra.mxu0 %v54_v10 }
   0xe   :  { %198 = vmatprep.subr.bf16.mxu0 %v222_v0 }
  0x15   :  { %199 = vmatpush3.bf16.xpose.msra.mxu0 %v57_v14 }
  0x16   :  { %200 = vmatprep.subr.bf16.mxu0 %v222_v0 }
  0x1d   :  { %201 = vmatpush3.bf16.xpose.msra.mxu0 %v60_v18 }
  0x1e   :  { %202 = vmatprep.subr.bf16.mxu0 %v222_v0 }
  0x25   :  { %203 = vmatpush3.bf16.xpose.msra.mxu0 %v63_v22 }
  0x26   :  { %204 = vmatprep.subr.bf16.mxu0 %v222_v0 }
  0x2d   :  { %205 = vmatpush3.bf16.xpose.msra.mxu0 %v66_v26 }
  0x2e   :  { %206 = vmatprep.subr.bf16.mxu0 %v222_v0 }
  0x35   :  { %207 = vmatpush3.bf16.xpose.msra.mxu0 %v69_v30 }
  0x36   :  { %208 = vmatprep.subr.bf16.mxu0 %v222_v0 }
  0x3d   :  { %209 = vmatpush3.bf16.xpose.msra.mxu0 %v72_v34 }
  0x44   :  { %211 = vmatmul.mubr.msk.bf16.vlgmr.msra.gmra.mrb[0].mxu0 %vm46_vm0, %v39_v35 }
  0x82   :  { %v44_v36 = vpop.permute.xlu0 %43 }
 0x117   :  { %v108_v37 = vpop.f32.mrb[0].mxu0 }
 0x118   :  { %v109_v38 = vadd.f32 %v108_v37, %v44_v36  ;;  %v212_v39 = vpop.f32.mrb[1].mxu0 }
 0x119   :  { %v111_v40 = vpop.f32.mrb[2].mxu0 }
 0x11a   :  { %v114_v41 = vrot.slane %v109_v38, 4  ;;  %v213_v42 = vpop.f32.mrb[3].mxu0 }
 0x11c   :  { %v115_v43 = vmax.f32 %v109_v38, %v114_v41 }
 0x11e   :  { %v116_v44 = vrot.slane %v115_v43, 2 }
 0x120   :  { %v117_v45 = vmax.f32 %v115_v43, %v116_v44 }
 0x122   :  { %v118_v46 = vrot.slane %v117_v45, 1 }
 0x124   :  { %v119_v47 = vmax.f32 %v117_v45, %v118_v46 }
 0x126   :  { %v120_v48 = vsub.f32 %v109_v38, %v119_v47 }
 0x128   :  { %v121_v49 = vmul.f32 1.442695, %v120_v48 }
 0x12a   :  { %218 = vpow2.f32 %v121_v49 }
 0x134   :  { %v219_v50 = vpop.eup %218 }
 0x135   :  { %v123_v51 = vrot.slane %v219_v50, 4 }
 0x137   :  { %v124_v52 = vadd.f32 %v219_v50, %v123_v51 }
 0x139   :  { %v125_v53 = vrot.slane %v124_v52, 2 }
 0x13b   :  { %v126_v54 = vadd.f32 %v125_v53, %v124_v52 }
 0x13d   :  { %v127_v55 = vrot.slane %v126_v54, 1 }
 0x13f   :  { %v128_v56 = vadd.f32 %v127_v55, %v126_v54 }
 0x141   :  { %220 = vrcp.f32 %v128_v56 }
 0x14b   :  { %v221_v57 = vpop.eup %220 }
 0x14c   :  { %v130_v58 = vmul.f32 %v221_v57, %v219_v50 }
 0x14e   :  { %131 = vxpose.xlu0.b32.start.end [1/1] (short) %v130_v58, 128 }
 0x1ce   :  { %v147_v59 = vpop.trf.xlu0 }
 0x1cf   :  { %164 = vst.msk [vmem:[%s375_s3] sm:$0xff] %vm163_vm2, %v147_v59 }
 0x1d2   :  { %v148_v60 = vpop.trf.xlu0 }
 0x1d3   :  { %165 = vst.msk [vmem:[%s375_s3 + $0x8] sm:$0xff] %vm163_vm2, %v148_v60 }
 0x1d6   :  { %v149_v61 = vpop.trf.xlu0 }
 0x1d7   :  { %166 = vst.msk [vmem:[%s375_s3 + $0x10] sm:$0xff] %vm163_vm2, %v149_v61 }
 0x1da   :  { %v150_v62 = vpop.trf.xlu0 }
 0x1db   :  { %167 = vst.msk [vmem:[%s375_s3 + $0x18] sm:$0xff] %vm163_vm2, %v150_v62 }
 0x1de   :  { %v151_v63 = vpop.trf.xlu0 }
 0x1df   :  { %168 = vst.msk [vmem:[%s375_s3 + $0x20] sm:$0xff] %vm163_vm2, %v151_v63 }
 0x1e2   :  { %v152_v0 = vpop.trf.xlu0 }
 0x1e3   :  { %169 = vst.msk [vmem:[%s375_s3 + $0x28] sm:$0xff] %vm163_vm2, %v152_v0 }
 0x1e6   :  { %v153_v1 = vpop.trf.xlu0 }
 0x1e7   :  { %170 = vst.msk [vmem:[%s375_s3 + $0x30] sm:$0xff] %vm163_vm2, %v153_v1 }
 0x1ea   :  { %v154_v2 = vpop.trf.xlu0 }
 0x1eb   :  { %171 = vst.msk [vmem:[%s375_s3 + $0x38] sm:$0xff] %vm163_vm2, %v154_v2 }
 0x1ee   :  { %v155_v3 = vpop.trf.xlu0 }
 0x1ef   :  { %172 = vst.msk [vmem:[%s375_s3 + $0x40] sm:$0xff] %vm163_vm2, %v155_v3 }
 0x1f2   :  { %v156_v4 = vpop.trf.xlu0 }
 0x1f3   :  { %173 = vst.msk [vmem:[%s375_s3 + $0x48] sm:$0xff] %vm163_vm2, %v156_v4 }
 0x1f6   :  { %v157_v5 = vpop.trf.xlu0 }
 0x1f7   :  { %174 = vst.msk [vmem:[%s375_s3 + $0x50] sm:$0xff] %vm163_vm2, %v157_v5 }
 0x1fa   :  { %v158_v6 = vpop.trf.xlu0 }
 0x1fb   :  { %175 = vst.msk [vmem:[%s375_s3 + $0x58] sm:$0xff] %vm163_vm2, %v158_v6 }
 0x1fe   :  { %v159_v7 = vpop.trf.xlu0 }
 0x1ff   :  { %176 = vst.msk [vmem:[%s375_s3 + $0x60] sm:$0xff] %vm163_vm2, %v159_v7 }
 0x202   :  { %v160_v8 = vpop.trf.xlu0 }
 0x203   :  { %177 = vst.msk [vmem:[%s375_s3 + $0x68] sm:$0xff] %vm163_vm2, %v160_v8 }
 0x206   :  { %v161_v9 = vpop.trf.xlu0 }
 0x207   :  { %178 = vst.msk [vmem:[%s375_s3 + $0x70] sm:$0xff] %vm163_vm2, %v161_v9 }
 0x20a   :  { %v162_v10 = vpop.trf.xlu0 }
 0x20b   :  { %179 = vst.msk [vmem:[%s375_s3 + $0x78] sm:$0xff] %vm163_vm2, %v162_v10 }

</bundles_post_ra>
